<compile_context>
chip_gen: v6e
topology: v6e:2x2x1
jax: 0.10.0
libtpu: 0.0.40
codegen_flags: <defaults>
</compile_context>

<pallas_src>
import math
import functools

import jax
import jax.numpy as jnp
from jax import lax
from jax.experimental import pallas as pl
from jax.experimental.pallas import tpu as pltpu


def _round_up(x: int, m: int) -> int:
    return (x + m - 1) // m * m


def _cdiv(a: int, b: int) -> int:
    return -(-a // b)


def _vmem_limit_bytes() -> int:
    """<= 3/4 of physical VMEM, capped at 96 MiB (works on v5e/v6e/v7x)."""
    try:
        cap = int(pltpu.get_tpu_info().vmem_capacity_bytes)
    except Exception:
        cap = 64 * 1024 * 1024
    return int(min(96 * 1024 * 1024, cap * 3 // 4))


def _linear_ln_pe_kernel(x_ref, w_ref, b_ref, g_ref, pe_ref, mask_ref, o_ref, *,
                         eps: float, odim: int, needs_mask: bool):
    """One (TM, odim_pad) row tile per grid step.

    x_ref   : (TM, idim_pad)        flattened (batch*time) rows, bf16
    w_ref   : (idim_pad, odim_pad)  weight, bf16 (zero-padded)
    b_ref   : (1, odim_pad)         linear bias (f32, zero-padded)
    g_ref   : (1, odim_pad)         gamma * sqrt(odim) (f32, zero-padded)
    pe_ref  : (TM, odim_pad)        pos_emb + beta*sqrt(odim) (f32, zero-padded)
    mask_ref: (1, odim_pad)         1.0 on true lanes, 0.0 on padded lanes
    o_ref   : (TM, odim_pad)
    """
    # Linear: bf16 MXU feed, f32 accumulation. Padded idim columns of x and rows
    # of W are zero, so they contribute nothing.
    y = jnp.dot(x_ref[...], w_ref[...], preferred_element_type=jnp.float32)
    y = y + b_ref[...]                                      # padded cols stay 0

    # LayerNorm over the TRUE odim (eps=1e-12, matches torch.nn.LayerNorm).
    inv_n = jnp.float32(1.0 / odim)
    mean = jnp.sum(y, axis=-1, keepdims=True) * inv_n        # padded cols are 0
    centered = y - mean
    if needs_mask:
        centered = centered * mask_ref[...]                  # zero padded lanes
    var = jnp.sum(centered * centered, axis=-1, keepdims=True) * inv_n
    norm = centered * lax.rsqrt(var + jnp.float32(eps))

    # Folded epilogue: norm * (gamma*sqrt(odim)) + (pe + beta*sqrt(odim)).
    # Padded lanes of g/pe are 0 -> padded output columns are exactly 0.
    o_ref[...] = (norm * g_ref[...] + pe_ref[...]).astype(o_ref.dtype)


def make_pos_enc_table(max_len: int, d_model: int) -> jnp.ndarray:
    """Standard sinusoidal positional-encoding table, shape (1, max_len, d_model)."""
    position = jnp.arange(max_len, dtype=jnp.float32)[:, None]
    div_term = jnp.exp(jnp.arange(0, d_model, 2, dtype=jnp.float32)
                       * -(math.log(10000.0) / d_model))
    pe = jnp.zeros((max_len, d_model), dtype=jnp.float32)
    pe = pe.at[:, 0::2].set(jnp.sin(position * div_term))
    pe = pe.at[:, 1::2].set(jnp.cos(position * div_term))
    return pe[None]


def linear_no_subsampling(x, x_mask, params, *, offset: int = 0,
                          block_rows: int = 1024,
                          mxu_dtype=jnp.bfloat16,
                          out_dtype=None,
                          min_grid_steps: int = 8):
    """JAX wrapper mirroring LinearNoSubsampling.forward (eval mode).

    x       : (B, T, idim)
    x_mask  : (B, 1, T) bool
    out_dtype: output dtype (default x.dtype; pass jnp.bfloat16 to halve the
               dominant output HBM stream when downstream accepts bf16).
    returns (out (B, T, odim), pos_emb (1, T, odim), x_mask)
    """
    B, T, idim = x.shape
    w = params["w"]                      # (idim, odim)
    odim = w.shape[1]
    out_dtype = x.dtype if out_dtype is None else out_dtype
    xscale = math.sqrt(float(odim))

    pos_emb = lax.dynamic_slice(params["pe"], (0, offset, 0), (1, T, odim))

    # Fold constants:  (yn*gamma + beta)*sqrt(odim) + pe
    #                = yn*(gamma*sqrt(odim)) + (pe + beta*sqrt(odim))
    gamma_eff = (params["gamma"].astype(jnp.float32) * xscale).reshape(1, odim)
    pe_eff = (pos_emb[0].astype(jnp.float32)
              + params["beta"].astype(jnp.float32) * xscale)          # (T, odim)
    bias = params["b"].astype(jnp.float32).reshape(1, odim)

    # --- 128-lane padding + row tiling over flattened (B*T) rows -------------
    idim_p = _round_up(idim, 128)
    odim_p = _round_up(odim, 128)

    SUB = 16                      # sublane granularity for bf16 x-feed / bf16 out
    max_tm = max(SUB, _round_up(block_rows, SUB))
    # Number of time tiles: (a) keep tiles <= block_rows, (b) give the grid at
    # least `min_grid_steps` total steps (pipelining + v7x's 2 TensorCores),
    # (c) never drop a tile below SUB rows; then size tm to minimize padding.
    nt_target = max(_cdiv(T, max_tm), _cdiv(min_grid_steps, max(B, 1)))
    nt_target = max(1, min(nt_target, _cdiv(T, SUB)))
    tm = _round_up(_cdiv(T, nt_target), SUB)
    nt = _cdiv(T, tm)
    t_pad = nt * tm

    # bf16 cast fused into the pad pass (halves the kernel-side x read stream).
    x_p = jnp.pad(x.astype(mxu_dtype),
                  ((0, 0), (0, t_pad - T), (0, idim_p - idim)))
    x_flat = x_p.reshape(B * t_pad, idim_p)

    w_p = jnp.pad(w, ((0, idim_p - idim), (0, odim_p - odim))).astype(mxu_dtype)
    bias_p = jnp.pad(bias, ((0, 0), (0, odim_p - odim)))
    gamma_p = jnp.pad(gamma_eff, ((0, 0), (0, odim_p - odim)))
    pe_p = jnp.pad(pe_eff, ((0, t_pad - T), (0, odim_p - odim)))
    lane_mask = jnp.pad(jnp.ones((1, odim), jnp.float32),
                        ((0, 0), (0, odim_p - odim)))

    kernel = functools.partial(_linear_ln_pe_kernel, eps=1e-12, odim=odim,
                               needs_mask=(odim_p != odim))

    rows = B * t_pad
    out_itemsize = jnp.dtype(out_dtype).itemsize
    cost = pl.CostEstimate(
        flops=int(2 * rows * idim_p * odim_p + 8 * rows * odim_p),
        transcendentals=int(rows),
        bytes_accessed=int(rows * idim_p * 2            # x (bf16)
                           + idim_p * odim_p * 2        # W (bf16)
                           + t_pad * odim_p * 4         # pe (f32)
                           + rows * odim_p * out_itemsize))

    out_flat = pl.pallas_call(
        kernel,
        out_shape=jax.ShapeDtypeStruct((rows, odim_p), out_dtype),
        grid_spec=pltpu.PrefetchScalarGridSpec(
            num_scalar_prefetch=0,
            # time tiles OUTER, batch INNER: W/bias/gamma/mask and the pe tile keep
            # the same block index across consecutive steps -> stay VMEM-resident.
            grid=(nt, B),
            in_specs=[
                pl.BlockSpec((tm, idim_p), lambda t, b: (b * nt + t, 0)),   # x rows
                pl.BlockSpec((idim_p, odim_p), lambda t, b: (0, 0)),        # W
                pl.BlockSpec((1, odim_p), lambda t, b: (0, 0)),             # bias
                pl.BlockSpec((1, odim_p), lambda t, b: (0, 0)),             # gamma'
                pl.BlockSpec((tm, odim_p), lambda t, b: (t, 0)),            # pe'
                pl.BlockSpec((1, odim_p), lambda t, b: (0, 0)),             # lane mask
            ],
            out_specs=pl.BlockSpec((tm, odim_p), lambda t, b: (b * nt + t, 0)),
        ),
        compiler_params=pltpu.CompilerParams(
            dimension_semantics=("parallel", "parallel"),
            vmem_limit_bytes=_vmem_limit_bytes()),
        cost_estimate=cost,
    )(x_flat, w_p, bias_p, gamma_p, pe_p, lane_mask)

    out = out_flat.reshape(B, t_pad, odim_p)
    # Skip the extra HBM pass entirely when the padded layout already matches.
    if t_pad != T or odim_p != odim:
        out = out[:, :T, :odim]
    return out, pos_emb, x_mask


def init_params(key, idim: int, odim: int, max_len: int = 5000):
    """Deterministic parameter init (mirrors nn.Linear + nn.LayerNorm shapes)."""
    k_w, k_b = jax.random.split(key)
    bound = 1.0 / math.sqrt(idim)
    # torch.nn.Linear stores weight as (odim, idim); we keep the transposed
    # (idim, odim) layout so the kernel computes x @ W directly.
    w = jax.random.uniform(k_w, (idim, odim), jnp.float32, -bound, bound)
    b = jax.random.uniform(k_b, (odim,), jnp.float32, -bound, bound)
    gamma = jnp.ones((odim,), jnp.float32)
    beta = jnp.zeros((odim,), jnp.float32)
    pe = make_pos_enc_table(max_len, odim)
    return {"w": w, "b": b, "gamma": gamma, "beta": beta, "pe": pe}


def _reference(x, params, offset, mxu_dtype):
    """Pure-JAX reference with the same bf16 MXU feeding / f32 accumulation."""
    T = x.shape[1]
    odim = params["w"].shape[1]
    xscale = math.sqrt(float(odim))
    y = jnp.dot(x.astype(mxu_dtype), params["w"].astype(mxu_dtype),
                preferred_element_type=jnp.float32) + params["b"]
    mean = y.mean(-1, keepdims=True)
    var = ((y - mean) ** 2).mean(-1, keepdims=True)
    yn = (y - mean) / jnp.sqrt(var + 1e-12)
    yn = yn * params["gamma"] + params["beta"]
    return yn * xscale + params["pe"][:, offset:offset + T]


if __name__ == "__main__":
    key = jax.random.PRNGKey(0)

    # Case 1: unaligned idim (fbank-like 80 -> pad to 128), aligned odim,
    #         T not a multiple of 16 (row padding), f32 output.
    # Case 2: unaligned odim (96 -> pad to 128, masked LayerNorm), nonzero offset.
    # Case 3: fully aligned T/odim (no post-kernel slice) with bf16 output.
    cases = [
        dict(B=2, T=10, idim=80, odim=256, offset=0, out_dtype=None,
             atol=2e-3, rtol=2e-3),
        dict(B=2, T=8, idim=32, odim=96, offset=3, out_dtype=None,
             atol=2e-3, rtol=2e-3),
        dict(B=2, T=32, idim=80, odim=256, offset=5, out_dtype=jnp.bfloat16,
             atol=1e-1, rtol=2e-2),
    ]

    for i, c in enumerate(cases):
        k_params, k_x, key = jax.random.split(key, 3)
        params = init_params(k_params, c["idim"], c["odim"], max_len=64)
        x = jax.random.normal(k_x, (c["B"], c["T"], c["idim"]), jnp.float32)
        x_mask = jnp.ones((c["B"], 1, c["T"]), dtype=jnp.bool_)

        fn = jax.jit(functools.partial(linear_no_subsampling,
                                       offset=c["offset"],
                                       out_dtype=c["out_dtype"]))
        out, pos_emb, mask_out = fn(x, x_mask, params)
        jax.block_until_ready(out)
        jax.block_until_ready(pos_emb)

        ref = _reference(x, params, c["offset"], jnp.bfloat16)

        assert out.shape == (c["B"], c["T"], c["odim"])
        assert pos_emb.shape == (1, c["T"], c["odim"])
        assert mask_out.shape == (c["B"], 1, c["T"])
        expected_dtype = x.dtype if c["out_dtype"] is None else c["out_dtype"]
        assert out.dtype == expected_dtype
        # Compared against a reference that uses the same bf16 MXU feeding
        # (vs. a pure-f32 reference the deviation is ~1e-2 relative, dominated
        # by the deliberate bf16 matmul inputs; LayerNorm renormalizes most of it).
        diff = jnp.max(jnp.abs(out.astype(jnp.float32) - ref))
        assert jnp.allclose(out.astype(jnp.float32), ref,
                            atol=c["atol"], rtol=c["rtol"]), (
            f"case {i}: max diff {diff}")

    print("KERNEL_OK")
</pallas_src>

<mosaic_0001>
module attributes {stable_mosaic.version = 11 : i64} {
  func.func @_linear_ln_pe_kernel(%arg0: i32, %arg1: i32, %arg2: memref<16x128xbf16, #tpu.memory_space<vmem>>, %arg3: memref<128x256xbf16, #tpu.memory_space<vmem>>, %arg4: memref<1x256xf32, #tpu.memory_space<vmem>>, %arg5: memref<1x256xf32, #tpu.memory_space<vmem>>, %arg6: memref<16x256xf32, #tpu.memory_space<vmem>>, %arg7: memref<1x256xf32, #tpu.memory_space<vmem>>, %arg8: memref<16x256xf32, #tpu.memory_space<vmem>>) attributes {dimension_semantics = [#tpu.dimension_semantics<parallel>, #tpu.dimension_semantics<parallel>], iteration_bounds = array<i64: 1, 2>, scalar_prefetch = 0 : i64, scratch_operands = 0 : i64, tpu.core_type = #tpu.core_type<tc>, window_params = [{transform_indices = @transform_0, window_bounds = array<i64: 16, 128>}, {pipeline_mode = #tpu.pipeline_mode<synchronous>, transform_indices = @transform_1, window_bounds = array<i64: 128, 256>}, {pipeline_mode = #tpu.pipeline_mode<synchronous>, transform_indices = @transform_2, window_bounds = array<i64: 1, 256>}, {pipeline_mode = #tpu.pipeline_mode<synchronous>, transform_indices = @transform_3, window_bounds = array<i64: 1, 256>}, {transform_indices = @transform_4, window_bounds = array<i64: 16, 256>}, {pipeline_mode = #tpu.pipeline_mode<synchronous>, transform_indices = @transform_5, window_bounds = array<i64: 1, 256>}, {transform_indices = @transform_6, window_bounds = array<i64: 16, 256>}]} {
    %c0 = arith.constant 0 : index
    %c0_0 = arith.constant 0 : index
    %0 = vector.load %arg2[%c0, %c0_0] : memref<16x128xbf16, #tpu.memory_space<vmem>>, vector<16x128xbf16>
    %c0_1 = arith.constant 0 : index
    %c0_2 = arith.constant 0 : index
    %1 = vector.load %arg3[%c0_1, %c0_2] : memref<128x256xbf16, #tpu.memory_space<vmem>>, vector<128x256xbf16>
    %cst = arith.constant dense<0.000000e+00> : vector<16x256xf32>
    %2 = tpu.matmul %0, %1, %cst {dimension_numbers = #tpu.dot_dimension_numbers<[1], [0], [0], [1], [0, 0, 1, 1], [], []>} : vector<16x128xbf16>, vector<128x256xbf16>, vector<16x256xf32> -> vector<16x256xf32>
    %c0_3 = arith.constant 0 : index
    %c0_4 = arith.constant 0 : index
    %3 = vector.load %arg4[%c0_3, %c0_4] : memref<1x256xf32, #tpu.memory_space<vmem>>, vector<1x256xf32>
    %4 = vector.broadcast %3 : vector<1x256xf32> to vector<16x256xf32>
    %5 = arith.addf %2, %4 : vector<16x256xf32>
    %cst_5 = arith.constant dense<0.000000e+00> : vector<16xf32>
    %6 = vector.multi_reduction <add>, %5, %cst_5 [1] : vector<16x256xf32> to vector<16xf32>
    %7 = vector.shape_cast %6 : vector<16xf32> to vector<16x1xf32>
    %cst_6 = arith.constant 3.906250e-03 : f32
    %8 = vector.broadcast %cst_6 : f32 to vector<16x1xf32>
    %9 = arith.mulf %7, %8 : vector<16x1xf32>
    %10 = vector.broadcast %9 : vector<16x1xf32> to vector<16x256xf32>
    %11 = arith.subf %5, %10 : vector<16x256xf32>
    %12 = arith.mulf %11, %11 : vector<16x256xf32>
    %cst_7 = arith.constant dense<0.000000e+00> : vector<16xf32>
    %13 = vector.multi_reduction <add>, %12, %cst_7 [1] : vector<16x256xf32> to vector<16xf32>
    %14 = vector.shape_cast %13 : vector<16xf32> to vector<16x1xf32>
    %cst_8 = arith.constant 3.906250e-03 : f32
    %15 = vector.broadcast %cst_8 : f32 to vector<16x1xf32>
    %16 = arith.mulf %14, %15 : vector<16x1xf32>
    %cst_9 = arith.constant 9.99999996E-13 : f32
    %17 = vector.broadcast %cst_9 : f32 to vector<16x1xf32>
    %18 = arith.addf %16, %17 : vector<16x1xf32>
    %19 = math.rsqrt %18 : vector<16x1xf32>
    %20 = vector.broadcast %19 : vector<16x1xf32> to vector<16x256xf32>
    %21 = arith.mulf %11, %20 : vector<16x256xf32>
    %c0_10 = arith.constant 0 : index
    %c0_11 = arith.constant 0 : index
    %22 = vector.load %arg5[%c0_10, %c0_11] : memref<1x256xf32, #tpu.memory_space<vmem>>, vector<1x256xf32>
    %23 = vector.broadcast %22 : vector<1x256xf32> to vector<16x256xf32>
    %24 = arith.mulf %21, %23 : vector<16x256xf32>
    %c0_12 = arith.constant 0 : index
    %c0_13 = arith.constant 0 : index
    %25 = vector.load %arg6[%c0_12, %c0_13] : memref<16x256xf32, #tpu.memory_space<vmem>>, vector<16x256xf32>
    %26 = arith.addf %24, %25 : vector<16x256xf32>
    %c0_14 = arith.constant 0 : index
    %c0_15 = arith.constant 0 : index
    %27 = vector.load %arg8[%c0_14, %c0_15] : memref<16x256xf32, #tpu.memory_space<vmem>>, vector<16x256xf32>
    tpu.vector_store %arg8[%c0_14, %c0_15], %26 {strides = array<i32>} : memref<16x256xf32, #tpu.memory_space<vmem>>, vector<16x256xf32>,
    return
  }
  func.func @transform_0(%arg0: i32, %arg1: i32) -> (i32, i32) {
    %c1_i32 = arith.constant 1 : i32
    %0 = arith.muli %arg1, %c1_i32 : i32
    %1 = arith.addi %0, %arg0 : i32
    %c0_i32 = arith.constant 0 : i32
    %c0_i32_0 = arith.constant 0 : i32
    return %1, %c0_i32 : i32, i32
  }
  func.func @transform_1(%arg0: i32, %arg1: i32) -> (i32, i32) {
    %c0_i32 = arith.constant 0 : i32
    %c0_i32_0 = arith.constant 0 : i32
    %c0_i32_1 = arith.constant 0 : i32
    return %c0_i32, %c0_i32_0 : i32, i32
  }
  func.func @transform_2(%arg0: i32, %arg1: i32) -> (i32, i32) {
    %c0_i32 = arith.constant 0 : i32
    %c0_i32_0 = arith.constant 0 : i32
    %c0_i32_1 = arith.constant 0 : i32
    return %c0_i32, %c0_i32_0 : i32, i32
  }
  func.func @transform_3(%arg0: i32, %arg1: i32) -> (i32, i32) {
    %c0_i32 = arith.constant 0 : i32
    %c0_i32_0 = arith.constant 0 : i32
    %c0_i32_1 = arith.constant 0 : i32
    return %c0_i32, %c0_i32_0 : i32, i32
  }
  func.func @transform_4(%arg0: i32, %arg1: i32) -> (i32, i32) {
    %c0_i32 = arith.constant 0 : i32
    %c0_i32_0 = arith.constant 0 : i32
    return %arg0, %c0_i32 : i32, i32
  }
  func.func @transform_5(%arg0: i32, %arg1: i32) -> (i32, i32) {
    %c0_i32 = arith.constant 0 : i32
    %c0_i32_0 = arith.constant 0 : i32
    %c0_i32_1 = arith.constant 0 : i32
    return %c0_i32, %c0_i32_0 : i32, i32
  }
  func.func @transform_6(%arg0: i32, %arg1: i32) -> (i32, i32) {
    %c1_i32 = arith.constant 1 : i32
    %0 = arith.muli %arg1, %c1_i32 : i32
    %1 = arith.addi %0, %arg0 : i32
    %c0_i32 = arith.constant 0 : i32
    %c0_i32_0 = arith.constant 0 : i32
    return %1, %c0_i32 : i32, i32
  }
}

</mosaic_0001>

<bundles_post_ra>
// kernel: linear_no_subsampling.1
= control target key start
LH: loop header
LB: loop body
LE: loop exit
PB: predicated region body
PF: predicated region fallthrough
CT: control target
= control target key end

     0   :  { %s756_s21 = smov 0   ;;  %s758_s22 = smov 0   ;;  %s859_s0 = inlined_call_operand.vmem [shape: bf16[32,128], index: 0, kind: input, shape index: {}]   ;;  %s860_s1 = inlined_call_operand.vmem [shape: bf16[128,256], index: 1, kind: input, shape index: {}]   ;;  %s861_s2 = inlined_call_operand.vmem [shape: f32[1,256], index: 2, kind: input, shape index: {}]   ;;  %s862_s3 = inlined_call_operand.vmem [shape: f32[1,256], index: 3, kind: input, shape index: {}]   ;;  %s863_s4 = inlined_call_operand.vmem [shape: f32[16,256], index: 4, kind: input, shape index: {}]   ;;  %s864_s5 = inlined_call_operand.vmem [shape: f32[1,256], index: 5, kind: input, shape index: {}]   ;;  %s865_s6 = inlined_call_operand.vmem [shape: f32[32,256], index: 6, kind: output, shape index: {}]  }
   0x1   :  { %s760_s23 = smov 0  }
   0x2 LB: > { %s25_s5 = sadd.s32 1, %s714_s22  ;;  %p616_p0 = scmp.ge.s32.totalorder %s718_s23, 1  ;;  %s718_s23 = sphi %s760_s23, %s16_s23   ;;  %s714_s22 = sphi %s758_s22, %s867_s22   ;;  %s710_s21 = sphi %s756_s21, %s866_s21  }
   0x3   : > { %p26_p1 = scmp.ge.s32.totalorder %s25_s5, 2  ;;  %p243_p2 = scmp.lt.s32.totalorder %s718_s23, 3 }
   0x5   : > { %s869_s5 = smov (%p26_p1, %s25_s5), 0  ;;  %p244_p3 = pnand %p616_p0, %p243_p2 }
   0x6   : > { %s617_s26 = sshll.u32 (!%p244_p3), %s710_s21, 1 }
   0x7   : > { %247 = sbr.rel (%p244_p3) target bundleno = 557 (0x22d), region = 44  ;;  %p284_p4 = scmp.lt.s32.totalorder (!%p244_p3), %s617_s26, 3 }
   0xc   : > { %v667_v0 = vld [vmem:[%s860_s1 + $0x74] ss:$8 sps:$4 sm:$0xff]   ;;  %v669_v1 = vld [vmem:[%s860_s1 + $0x70] ss:$8 sps:$4 sm:$0xff]   ;;  %v720_v2 = vmov 0   ;;  %s871_s26 = smov (!%p284_p4, %s617_s26), 3  ;;  %v327_v18 = vlaneseq }
   0xd   : > { %455 = vmatprep.mubr.bf16.mxu0 %v720_v2  ;;  %423 = vmatprep.subr.bf16.mxu0 %v667_v0  ;;  %v670_v3 = vld [vmem:[%s860_s1 + $0x64] ss:$8 sps:$4 sm:$0xff]   ;;  %v672_v4 = vld [vmem:[%s860_s1 + $0x60] ss:$8 sps:$4 sm:$0xff]   ;;  %v673_v5 = vld [vmem:[%s860_s1 + $0x54] ss:$8 sps:$4 sm:$0xff]  }
   0xe   : > { %424 = vmatpush1.bf16.msra.mxu0 %v669_v1  ;;  %s618_s11 = sshll.u32 %s871_s26, 2  ;;  %v675_v6 = vld [vmem:[%s860_s1 + $0x50] ss:$8 sps:$4 sm:$0xff]   ;;  %v676_v7 = vld [vmem:[%s860_s1 + $0x44] ss:$8 sps:$4 sm:$0xff]   ;;  %v328_v19 = vshrl.u32 %v327_v18, 7 }
   0xf   : > { %425 = vmatprep.subr.bf16.mxu0 %v670_v3  ;;  %s287_s18 = scalar_lea.vmem %s859_s0, %s618_s11  ;;  %v678_v8 = vld [vmem:[%s860_s1 + $0x40] ss:$8 sps:$4 sm:$0xff]   ;;  %v679_v9 = vld [vmem:[%s860_s1 + $0x34] ss:$8 sps:$4 sm:$0xff]   ;;  %v681_v10 = vld [vmem:[%s860_s1 + $0x30] ss:$8 sps:$4 sm:$0xff]  }
  0x10   : > { %v682_v11 = vld [vmem:[%s860_s1 + $0x24] ss:$8 sps:$4 sm:$0xff]   ;;  %v684_v12 = vld [vmem:[%s860_s1 + $0x20] ss:$8 sps:$4 sm:$0xff]   ;;  %v685_v13 = vld [vmem:[%s860_s1 + $0x14] ss:$8 sps:$4 sm:$0xff]  }
  0x11   : > { %v687_v14 = vld [vmem:[%s860_s1 + $0x10] ss:$8 sps:$4 sm:$0xff]   ;;  %v688_v15 = vld [vmem:[%s860_s1 + $0x4] ss:$8 sps:$4 sm:$0xff]   ;;  %v690_v16 = vld [vmem:[%s860_s1] ss:$8 sps:$4 sm:$0xff]  }
  0x12   : > { %426 = vmatpush1.bf16.msra.mxu0 %v672_v4  ;;  %v691_v17 = vld [vmem:[%s287_s18] sm:$0xff]   ;;  %v329_v20 = vsub.s32 0, %v328_v19  ;;  %v333_v21 = vsub.s32 1, %v328_v19  ;;  %s641_s20 = sshll.u32 %s871_s26, 4  ;;  %v515_v62 = vld [vmem:[%s863_s4 + $0x8] sm:$0xff] }
  0x13   : > { %427 = vmatprep.subr.bf16.mxu0 %v673_v5  ;;  %v325_v22 = vld [vmem:[%s861_s2] sm:$0x3]  ;;  %s303_s30 = scalar_lea.vmem %s865_s6, %s641_s20 }
  0x14   : > { %v330_v23 = vrot.slane %v325_v22, %v329_v20  ;;  %v334_v24 = vrot.slane %v325_v22, %v333_v21  ;;  %v498_v55 = vld [vmem:[%s862_s3] sm:$0x3] }
  0x15   : > { %v503_v56 = vrot.slane %v498_v55, %v329_v20  ;;  %v507_v57 = vrot.slane %v498_v55, %v333_v21  ;;  %v514_v61 = vld [vmem:[%s863_s4] sm:$0xff] }
  0x16   : > { %428 = vmatpush1.bf16.msra.mxu0 %v675_v6  ;;  %v516_v6 = vld [vmem:[%s863_s4 + $0x10] sm:$0xff] }
  0x17   : > { %429 = vmatprep.subr.bf16.mxu0 %v676_v7  ;;  %v517_v7 = vld [vmem:[%s863_s4 + $0x18] sm:$0xff] }
  0x1a   : > { %430 = vmatpush1.bf16.msra.mxu0 %v678_v8 }
  0x1b   : > { %431 = vmatprep.subr.bf16.mxu0 %v679_v9 }
  0x1e   : > { %432 = vmatpush1.bf16.msra.mxu0 %v681_v10 }
  0x1f   : > { %433 = vmatprep.subr.bf16.mxu0 %v682_v11 }
  0x22   : > { %434 = vmatpush1.bf16.msra.mxu0 %v684_v12 }
  0x23   : > { %435 = vmatprep.subr.bf16.mxu0 %v685_v13 }
  0x26   : > { %436 = vmatpush1.bf16.msra.mxu0 %v687_v14 }
  0x27   : > { %437 = vmatprep.subr.bf16.mxu0 %v688_v15 }
  0x2a   : > { %438 = vmatpush1.bf16.msra.mxu0 %v690_v16 }
  0x2d   : > { %456 = vmatmul.mubr.bf16.vlgmr.msra.gmra.mxu0 %v691_v17 }
  0xed   : > { %v457_v25 = vpop.f32.mrf.mxu0 }
  0xee   : > { %v458_v27 = vadd.f32 %v457_v25, %v330_v23 }
  0xef   : > { %v459_v26 = vpop.f32.mrf.mxu0 }
  0xf0   : > { %v460_v28 = vadd.f32 %v459_v26, %v334_v24 }
  0xf1   : > { %v461_v29 = vpop.f32.mrf.mxu0 }
  0xf2   : > { %v466_v30 = vadd.f32 %v460_v28, %v458_v27  ;;  %v462_v32 = vadd.f32 %v461_v29, %v330_v23 }
  0xf3   : > { %v463_v31 = vpop.f32.mrf.mxu0 }
  0xf4   : > { %v464_v33 = vadd.f32 %v463_v31, %v334_v24  ;;  %467 = vadd.xlane.f32.xlu0 %v466_v30 }
  0xf6   : > { %v469_v34 = vadd.f32 %v464_v33, %v462_v32 }
  0xf8   : > { %470 = vadd.xlane.f32.xlu0 %v469_v34 }
 0x17d   : > { %v468_v35 = vpop.xlane.xlu0 %467 }
 0x17e   : > { %v472_v36 = vmul.f32 0.00390625, %v468_v35 }
 0x180   : > { %v474_v37 = vsub.f32 %v458_v27, %v472_v36  ;;  %v475_v38 = vsub.f32 %v460_v28, %v472_v36 }
 0x181   : > { %v471_v39 = vpop.xlane.xlu0 %470 }
 0x182   : > { %v473_v40 = vmul.f32 0.00390625, %v471_v39  ;;  %v478_v41 = vmul.f32 %v474_v37, %v474_v37  ;;  %v479_v42 = vmul.f32 %v475_v38, %v475_v38 }
 0x184   : > { %v476_v43 = vsub.f32 %v462_v32, %v473_v40  ;;  %v477_v44 = vsub.f32 %v464_v33, %v473_v40  ;;  %v482_v45 = vadd.f32 %v479_v42, %v478_v41 }
 0x186   : > { %483 = vadd.xlane.f32.xlu1 %v482_v45  ;;  %v480_v46 = vmul.f32 %v476_v43, %v476_v43  ;;  %v481_v47 = vmul.f32 %v477_v44, %v477_v44 }
 0x188   : > { %v485_v48 = vadd.f32 %v481_v47, %v480_v46 }
 0x18a   : > { %486 = vadd.xlane.f32.xlu1 %v485_v48 }
 0x20f   : > { %v484_v49 = vpop.xlane.xlu1 %483 }
 0x210   : > { %v488_v50 = vmul.f32 0.00390625, %v484_v49 }
 0x212   : > { %v490_v51 = vadd.f32 1e-12, %v488_v50 }
 0x213   : > { %v487_v52 = vpop.xlane.xlu1 %486 }
 0x214   : > { %692 = vrsqrt.f32 %v490_v51  ;;  %v489_v53 = vmul.f32 0.00390625, %v487_v52 }
 0x216   : > { %v491_v54 = vadd.f32 1e-12, %v489_v53 }
 0x218   : > { %694 = vrsqrt.f32 %v491_v54 }
 0x221   : > { %v693_v58 = vpop.eup %692 }
 0x222   : > { %v494_v59 = vmul.f32 %v693_v58, %v474_v37  ;;  %v495_v60 = vmul.f32 %v693_v58, %v475_v38 }
 0x224   : > { %v510_v63 = vmul.f32 %v503_v56, %v494_v59  ;;  %v511_v0 = vmul.f32 %v507_v57, %v495_v60 }
 0x225   : > { %v695_v1 = vpop.eup %694 }
 0x226   : > { %v518_v2 = vadd.f32 %v514_v61, %v510_v63  ;;  %v519_v3 = vadd.f32 %v515_v62, %v511_v0  ;;  %v496_v4 = vmul.f32 %v695_v1, %v476_v43  ;;  %v497_v5 = vmul.f32 %v695_v1, %v477_v44 }
 0x228   : > { %522 = vst [vmem:[%s303_s30] sm:$0xff] %v518_v2  ;;  %523 = vst [vmem:[%s303_s30 + $0x8] sm:$0xff] %v519_v3  ;;  %v512_v8 = vmul.f32 %v503_v56, %v496_v4  ;;  %v513_v9 = vmul.f32 %v507_v57, %v497_v5 }
 0x22a   : > { %v520_v10 = vadd.f32 %v516_v6, %v512_v8  ;;  %v521_v11 = vadd.f32 %v517_v7, %v513_v9 }
 0x22c   : > { %524 = vst [vmem:[%s303_s30 + $0x10] sm:$0xff] %v520_v10  ;;  %525 = vst [vmem:[%s303_s30 + $0x18] sm:$0xff] %v521_v11 }
 0x22d PF: > { %s16_s23 = sadd.s32 1, %s718_s23   ;;  %s866_s21 = smov %s714_s22 }
 0x22e   : > { %p13_p5 = scmp.ge.s32.totalorder %s16_s23, 4   ;;  %s867_s22 = smov %s869_s5 }
 0x230   :  { %15 = sbr.rel (!%p13_p5) target bundleno = 2 (0x2), region = 77 }

</bundles_post_ra>
